<compile_context>
chip_gen: v6e
topology: v6e:2x2x1
jax: 0.10.0
libtpu: 0.0.40
codegen_flags: <defaults>
</compile_context>

<pallas_src>
import math
import functools

import jax
import jax.numpy as jnp
from jax import lax
from jax.experimental import pallas as pl
from jax.experimental.pallas import tpu as pltpu


# ----------------------------------------------------------------------------
# Fused Pallas kernel: QKV proj + per-head attention + lexicon mix + output proj
# ----------------------------------------------------------------------------
def _fused_mha_kernel(q_ref, k_ref, v_ref, lex_ref, mask_ref,
                      w_ref, b_ref, o_ref, *, heads, d_k):
    S = q_ref.shape[1]

    xq = q_ref[0]                       # (S, d_model)
    xk = k_ref[0]
    xv = v_ref[0]

    # Additive mask bias computed once per batch and reused by every head and the
    # lexicon softmax.  (Additive -1e9 differs from masked_fill only for fully
    # masked rows, which do not occur; otherwise probabilities are exactly 0.)
    mask_bias = jnp.where(mask_ref[0] == 1, jnp.float32(-1e9), jnp.float32(0.0))

    # Stacked weights (pre-transposed to (in, out) in the wrapper):
    #   w_ref[0] = wq^T * 1/sqrt(d_k), w_ref[1] = wk^T, w_ref[2] = wv^T,
    #   w_ref[3] = wo^T * 0.5
    wq = w_ref[0]
    wk = w_ref[1]
    wv = w_ref[2]
    wo_half = w_ref[3]

    # Packed biases: row 0 = bq * 1/sqrt(d_k), row 1 = bv, row 2 = bo.
    bq = b_ref[0:1, :]                  # (1, d_model)
    bv = b_ref[1:2, :]
    bo = b_ref[2:3, :]

    # Projections.  bk is dropped (cancels exactly under the row softmax).
    q_all = jnp.dot(xq, wq, preferred_element_type=jnp.float32) + bq
    k_all = jnp.dot(xk, wk, preferred_element_type=jnp.float32)
    v_all = jnp.dot(xv, wv, preferred_element_type=jnp.float32) + bv

    def softmax_rows(x):
        m = jnp.max(x, axis=-1, keepdims=True)
        e = jnp.exp(x - m)
        # exact reciprocal keeps the 1e-4 tolerance; approx=True (EUP slot) is a
        # free candidate once the kernel is no longer overhead-bound.
        return e * pl.reciprocal(jnp.sum(e, axis=-1, keepdims=True), approx=False)

    # Head-invariant lexicon softmax, once per batch (row-broadcast of the
    # precomputed (1, S) lexicon projection).
    lex_p = softmax_rows(jnp.broadcast_to(lex_ref[0], (S, S)) + mask_bias)

    # Per-head attention (statically unrolled at these sizes).  Only the PV
    # result is produced per head; the lexicon term and the output projection
    # are applied once, outside the loop.
    head_outs = []
    for h in range(heads):
        lo = h * d_k
        hi = lo + d_k
        qh = q_all[:, lo:hi]            # (S, d_k)
        kh = k_all[:, lo:hi]
        vh = v_all[:, lo:hi]
        # q @ k^T without an explicit transpose (contract on dim 1 of both).
        scores = lax.dot_general(qh, kh, (((1,), (1,)), ((), ())),
                                 preferred_element_type=jnp.float32) + mask_bias
        head_outs.append(jnp.dot(softmax_rows(scores), vh,
                                 preferred_element_type=jnp.float32))   # (S, d_k)

    concat = jnp.concatenate(head_outs, axis=-1)                        # (S, d_model)

    # Hoisted lexicon contribution: sum_h lex_p @ v_h @ Wo_h == lex_p @ v_all @ Wo^T.
    mixed = concat + jnp.dot(lex_p, v_all, preferred_element_type=jnp.float32)

    # Single output projection; the 0.5 of "(scores + lex)/2" is folded into wo_half.
    o_ref[0] = jnp.dot(mixed, wo_half, preferred_element_type=jnp.float32) + bo


# ----------------------------------------------------------------------------
# Module-level wrapper (mirrors MultiHeadedAttention.forward)
# ----------------------------------------------------------------------------
def multi_headed_attention(q_in, k_in, v_in, params, *, heads, mask=None,
                           lexicon=None):
    bs, S, d_model = q_in.shape
    d_k = d_model // heads
    scale = 1.0 / math.sqrt(d_k)

    # One-time parameter prep (outside the kernel): transpose to (in, out),
    # fold 1/sqrt(d_k) into the Q projection, 0.5 into the output projection,
    # and stack everything into two lane-dense operands.
    wq_t = (params["wq"].T * scale).astype(jnp.float32)
    wk_t = params["wk"].T.astype(jnp.float32)
    wv_t = params["wv"].T.astype(jnp.float32)
    wo_half = (params["wo"].T * 0.5).astype(jnp.float32)
    w_all = jnp.stack([wq_t, wk_t, wv_t, wo_half])          # (4, d_model, d_model)

    bq = (params["bq"] * scale).astype(jnp.float32)
    bv = params["bv"].astype(jnp.float32)
    bo = params["bo"].astype(jnp.float32)                    # NOT scaled by 0.5
    b_all = jnp.stack([bq, bv, bo])                          # (3, d_model)

    # Lexicon projection precomputed (tiny (bs,S)@(S,S)); /1000 folded in.
    lex_row = ((lexicon.astype(jnp.float32) / 1000.0) @ params["wl"].T
               + params["bl"]).reshape(bs, 1, S)

    # Raw integer mask (1 == masked); expanded to an additive bias in-kernel.
    if mask is None:
        mask_i = jnp.zeros((bs, S, S), jnp.int32)
    else:
        mask_i = mask.astype(jnp.int32)

    kernel = functools.partial(_fused_mha_kernel, heads=heads, d_k=d_k)
    per_b3 = lambda b: (b, 0, 0)

    out = pl.pallas_call(
        kernel,
        out_shape=jax.ShapeDtypeStruct((bs, S, d_model), jnp.float32),
        grid=(bs,),
        in_specs=[
            pl.BlockSpec((1, S, d_model), per_b3),           # q
            pl.BlockSpec((1, S, d_model), per_b3),           # k
            pl.BlockSpec((1, S, d_model), per_b3),           # v
            pl.BlockSpec((1, 1, S), per_b3),                 # projected lexicon row
            pl.BlockSpec((1, S, S), per_b3),                 # int mask (1 == masked)
            pl.BlockSpec((4, d_model, d_model), lambda b: (0, 0, 0)),   # stacked weights
            pl.BlockSpec((3, d_model), lambda b: (0, 0)),               # packed biases
        ],
        out_specs=pl.BlockSpec((1, S, d_model), per_b3),
        compiler_params=pltpu.CompilerParams(
            dimension_semantics=("parallel",),
        ),
    )(q_in, k_in, v_in, lex_row, mask_i, w_all, b_all)
    return out


# ----------------------------------------------------------------------------
# Pure-JAX reference (mirrors the PyTorch module, for correctness check)
# ----------------------------------------------------------------------------
def reference(q_in, k_in, v_in, params, *, heads, mask, lexicon):
    bs, S, d_model = q_in.shape
    d_k = d_model // heads
    lin = lambda x, w, b: x @ w.T + b
    qh = lin(q_in, params["wq"], params["bq"]).reshape(bs, S, heads, d_k).transpose(0, 2, 1, 3)
    kh = lin(k_in, params["wk"], params["bk"]).reshape(bs, S, heads, d_k).transpose(0, 2, 1, 3)
    vh = lin(v_in, params["wv"], params["bv"]).reshape(bs, S, heads, d_k).transpose(0, 2, 1, 3)
    lex = lin(lexicon / 1000.0, params["wl"], params["bl"])            # (bs, S)
    scores = qh @ kh.transpose(0, 1, 3, 2) / math.sqrt(d_k)            # (bs,h,S,S)
    lex_b = jnp.broadcast_to(lex[:, None, None, :], (bs, 1, S, S))
    m = (mask[:, None] == 1)
    scores = jnp.where(m, -1e9, scores)
    lex_b = jnp.where(m, -1e9, lex_b)
    scores = jax.nn.softmax(scores, axis=-1)
    lex_b = jax.nn.softmax(lex_b, axis=-1)
    p = (scores + jnp.broadcast_to(lex_b, scores.shape)) / 2.0
    outh = p @ vh
    concat = outh.transpose(0, 2, 1, 3).reshape(bs, S, d_model)
    return lin(concat, params["wo"], params["bo"])


# ----------------------------------------------------------------------------
# Main
# ----------------------------------------------------------------------------
if __name__ == "__main__":
    bs, heads, d_model, sent_len = 2, 4, 32, 8
    S = sent_len

    key = jax.random.PRNGKey(0)
    keys = jax.random.split(key, 16)

    def init_linear(k_w, k_b, out_dim, in_dim):
        bound = 1.0 / math.sqrt(in_dim)
        w = jax.random.uniform(k_w, (out_dim, in_dim), jnp.float32, -bound, bound)
        b = jax.random.uniform(k_b, (out_dim,), jnp.float32, -bound, bound)
        return w, b

    wq, bq = init_linear(keys[0], keys[1], d_model, d_model)
    wk, bk = init_linear(keys[2], keys[3], d_model, d_model)
    wv, bv = init_linear(keys[4], keys[5], d_model, d_model)
    wo, bo = init_linear(keys[6], keys[7], d_model, d_model)
    wl, bl = init_linear(keys[8], keys[9], sent_len, sent_len)
    params = dict(wq=wq, bq=bq, wk=wk, bk=bk, wv=wv, bv=bv,
                  wo=wo, bo=bo, wl=wl, bl=bl)

    q = jax.random.normal(keys[10], (bs, S, d_model), jnp.float32)
    k = jax.random.normal(keys[11], (bs, S, d_model), jnp.float32)
    v = jax.random.normal(keys[12], (bs, S, d_model), jnp.float32)
    lexicon = jax.random.uniform(keys[13], (bs, sent_len), jnp.float32, 0.0, 1000.0)
    # causal-style mask: 1 == masked (no fully-masked rows)
    mask = jnp.triu(jnp.ones((S, S), jnp.int32), k=1)[None].repeat(bs, axis=0)

    out = multi_headed_attention(q, k, v, params, heads=heads,
                                 mask=mask, lexicon=lexicon)
    out = jax.block_until_ready(out)

    ref = reference(q, k, v, params, heads=heads, mask=mask, lexicon=lexicon)
    assert out.shape == (bs, S, d_model)
    assert jnp.allclose(out, ref, atol=1e-4, rtol=1e-4), (
        f"max abs err {jnp.max(jnp.abs(out - ref))}"
    )
    print("KERNEL_OK")
</pallas_src>

<mosaic_0001>
module attributes {stable_mosaic.version = 11 : i64} {
  func.func @_fused_mha_kernel(%arg0: i32, %arg1: memref<1x8x32xf32, #tpu.memory_space<vmem>>, %arg2: memref<1x8x32xf32, #tpu.memory_space<vmem>>, %arg3: memref<1x8x32xf32, #tpu.memory_space<vmem>>, %arg4: memref<1x1x8xf32, #tpu.memory_space<vmem>>, %arg5: memref<1x8x8xi32, #tpu.memory_space<vmem>>, %arg6: memref<4x32x32xf32, #tpu.memory_space<vmem>>, %arg7: memref<3x32xf32, #tpu.memory_space<vmem>>, %arg8: memref<1x8x32xf32, #tpu.memory_space<vmem>>) attributes {dimension_semantics = [#tpu.dimension_semantics<parallel>], iteration_bounds = array<i64: 2>, scalar_prefetch = 0 : i64, scratch_operands = 0 : i64, tpu.core_type = #tpu.core_type<tc>, window_params = [{transform_indices = @transform_0, window_bounds = array<i64: 1, 8, 32>}, {transform_indices = @transform_1, window_bounds = array<i64: 1, 8, 32>}, {transform_indices = @transform_2, window_bounds = array<i64: 1, 8, 32>}, {transform_indices = @transform_3, window_bounds = array<i64: 1, 1, 8>}, {transform_indices = @transform_4, window_bounds = array<i64: 1, 8, 8>}, {pipeline_mode = #tpu.pipeline_mode<synchronous>, transform_indices = @transform_5, window_bounds = array<i64: 4, 32, 32>}, {pipeline_mode = #tpu.pipeline_mode<synchronous>, transform_indices = @transform_6, window_bounds = array<i64: 3, 32>}, {transform_indices = @transform_7, window_bounds = array<i64: 1, 8, 32>}]} {
    %c0 = arith.constant 0 : index
    %c0_0 = arith.constant 0 : index
    %c0_1 = arith.constant 0 : index
    %0 = vector.load %arg1[%c0, %c0_0, %c0_1] : memref<1x8x32xf32, #tpu.memory_space<vmem>>, vector<1x8x32xf32>
    %1 = vector.shape_cast %0 : vector<1x8x32xf32> to vector<8x32xf32>
    %c0_2 = arith.constant 0 : index
    %c0_3 = arith.constant 0 : index
    %c0_4 = arith.constant 0 : index
    %2 = vector.load %arg2[%c0_2, %c0_3, %c0_4] : memref<1x8x32xf32, #tpu.memory_space<vmem>>, vector<1x8x32xf32>
    %3 = vector.shape_cast %2 : vector<1x8x32xf32> to vector<8x32xf32>
    %c0_5 = arith.constant 0 : index
    %c0_6 = arith.constant 0 : index
    %c0_7 = arith.constant 0 : index
    %4 = vector.load %arg3[%c0_5, %c0_6, %c0_7] : memref<1x8x32xf32, #tpu.memory_space<vmem>>, vector<1x8x32xf32>
    %5 = vector.shape_cast %4 : vector<1x8x32xf32> to vector<8x32xf32>
    %c0_8 = arith.constant 0 : index
    %c0_9 = arith.constant 0 : index
    %c0_10 = arith.constant 0 : index
    %6 = vector.load %arg5[%c0_8, %c0_9, %c0_10] : memref<1x8x8xi32, #tpu.memory_space<vmem>>, vector<1x8x8xi32>
    %7 = vector.shape_cast %6 : vector<1x8x8xi32> to vector<8x8xi32>
    %c1_i32 = arith.constant 1 : i32
    %8 = vector.broadcast %c1_i32 : i32 to vector<8x8xi32>
    %9 = arith.cmpi eq, %7, %8 : vector<8x8xi32>
    %cst = arith.constant -1.000000e+09 : f32
    %cst_11 = arith.constant 0.000000e+00 : f32
    %10 = vector.broadcast %cst : f32 to vector<8x8xf32>
    %11 = vector.broadcast %cst_11 : f32 to vector<8x8xf32>
    %12 = arith.select %9, %10, %11 : vector<8x8xi1>, vector<8x8xf32>
    %c0_12 = arith.constant 0 : index
    %c0_13 = arith.constant 0 : index
    %c0_14 = arith.constant 0 : index
    %13 = vector.load %arg6[%c0_12, %c0_13, %c0_14] : memref<4x32x32xf32, #tpu.memory_space<vmem>>, vector<1x32x32xf32>
    %14 = vector.shape_cast %13 : vector<1x32x32xf32> to vector<32x32xf32>
    %c1 = arith.constant 1 : index
    %c0_15 = arith.constant 0 : index
    %c0_16 = arith.constant 0 : index
    %15 = vector.load %arg6[%c1, %c0_15, %c0_16] : memref<4x32x32xf32, #tpu.memory_space<vmem>>, vector<1x32x32xf32>
    %16 = vector.shape_cast %15 : vector<1x32x32xf32> to vector<32x32xf32>
    %c2 = arith.constant 2 : index
    %c0_17 = arith.constant 0 : index
    %c0_18 = arith.constant 0 : index
    %17 = vector.load %arg6[%c2, %c0_17, %c0_18] : memref<4x32x32xf32, #tpu.memory_space<vmem>>, vector<1x32x32xf32>
    %18 = vector.shape_cast %17 : vector<1x32x32xf32> to vector<32x32xf32>
    %c3 = arith.constant 3 : index
    %c0_19 = arith.constant 0 : index
    %c0_20 = arith.constant 0 : index
    %19 = vector.load %arg6[%c3, %c0_19, %c0_20] : memref<4x32x32xf32, #tpu.memory_space<vmem>>, vector<1x32x32xf32>
    %20 = vector.shape_cast %19 : vector<1x32x32xf32> to vector<32x32xf32>
    %c0_21 = arith.constant 0 : index
    %c0_22 = arith.constant 0 : index
    %21 = vector.load %arg7[%c0_21, %c0_22] : memref<3x32xf32, #tpu.memory_space<vmem>>, vector<1x32xf32>
    %c1_23 = arith.constant 1 : index
    %c0_24 = arith.constant 0 : index
    %22 = vector.load %arg7[%c1_23, %c0_24] : memref<3x32xf32, #tpu.memory_space<vmem>>, vector<1x32xf32>
    %c2_25 = arith.constant 2 : index
    %c0_26 = arith.constant 0 : index
    %23 = vector.load %arg7[%c2_25, %c0_26] : memref<3x32xf32, #tpu.memory_space<vmem>>, vector<1x32xf32>
    %cst_27 = arith.constant dense<0.000000e+00> : vector<8x32xf32>
    %24 = tpu.matmul %1, %14, %cst_27 {dimension_numbers = #tpu.dot_dimension_numbers<[1], [0], [0], [1], [0, 0, 1, 1], [], []>} : vector<8x32xf32>, vector<32x32xf32>, vector<8x32xf32> -> vector<8x32xf32>
    %25 = vector.broadcast %21 : vector<1x32xf32> to vector<8x32xf32>
    %26 = arith.addf %24, %25 : vector<8x32xf32>
    %cst_28 = arith.constant dense<0.000000e+00> : vector<8x32xf32>
    %27 = tpu.matmul %3, %16, %cst_28 {dimension_numbers = #tpu.dot_dimension_numbers<[1], [0], [0], [1], [0, 0, 1, 1], [], []>} : vector<8x32xf32>, vector<32x32xf32>, vector<8x32xf32> -> vector<8x32xf32>
    %cst_29 = arith.constant dense<0.000000e+00> : vector<8x32xf32>
    %28 = tpu.matmul %5, %18, %cst_29 {dimension_numbers = #tpu.dot_dimension_numbers<[1], [0], [0], [1], [0, 0, 1, 1], [], []>} : vector<8x32xf32>, vector<32x32xf32>, vector<8x32xf32> -> vector<8x32xf32>
    %29 = vector.broadcast %22 : vector<1x32xf32> to vector<8x32xf32>
    %30 = arith.addf %28, %29 : vector<8x32xf32>
    %c0_30 = arith.constant 0 : index
    %c0_31 = arith.constant 0 : index
    %c0_32 = arith.constant 0 : index
    %31 = vector.load %arg4[%c0_30, %c0_31, %c0_32] : memref<1x1x8xf32, #tpu.memory_space<vmem>>, vector<1x1x8xf32>
    %32 = vector.shape_cast %31 : vector<1x1x8xf32> to vector<1x8xf32>
    %33 = vector.shape_cast %32 : vector<1x8xf32> to vector<1x8xf32>
    %34 = vector.broadcast %33 : vector<1x8xf32> to vector<8x8xf32>
    %35 = arith.addf %34, %12 : vector<8x8xf32>
    %cst_33 = arith.constant dense<0xFF800000> : vector<8xf32>
    %36 = vector.multi_reduction <maximumf>, %35, %cst_33 [1] : vector<8x8xf32> to vector<8xf32>
    %37 = vector.shape_cast %36 : vector<8xf32> to vector<8x1xf32>
    %38 = vector.broadcast %37 : vector<8x1xf32> to vector<8x8xf32>
    %39 = arith.subf %35, %38 : vector<8x8xf32>
    %40 = math.exp %39 : vector<8x8xf32>
    %cst_34 = arith.constant dense<0.000000e+00> : vector<8xf32>
    %41 = vector.multi_reduction <add>, %40, %cst_34 [1] : vector<8x8xf32> to vector<8xf32>
    %42 = vector.shape_cast %41 : vector<8xf32> to vector<8x1xf32>
    %43 = tpu.reciprocal %42 : vector<8x1xf32> -> vector<8x1xf32>
    %44 = vector.broadcast %43 : vector<8x1xf32> to vector<8x8xf32>
    %45 = arith.mulf %40, %44 : vector<8x8xf32>
    %46 = vector.extract_strided_slice %26 {offsets = [0, 0], sizes = [8, 8], strides = [1, 1]} : vector<8x32xf32> to vector<8x8xf32>
    %47 = vector.extract_strided_slice %27 {offsets = [0, 0], sizes = [8, 8], strides = [1, 1]} : vector<8x32xf32> to vector<8x8xf32>
    %48 = vector.extract_strided_slice %30 {offsets = [0, 0], sizes = [8, 8], strides = [1, 1]} : vector<8x32xf32> to vector<8x8xf32>
    %cst_35 = arith.constant dense<0.000000e+00> : vector<8x8xf32>
    %49 = tpu.matmul %46, %47, %cst_35 {dimension_numbers = #tpu.dot_dimension_numbers<[1], [1], [0], [0], [0, 0, 1, 0], [], []>} : vector<8x8xf32>, vector<8x8xf32>, vector<8x8xf32> -> vector<8x8xf32>
    %50 = arith.addf %49, %12 : vector<8x8xf32>
    %cst_36 = arith.constant dense<0xFF800000> : vector<8xf32>
    %51 = vector.multi_reduction <maximumf>, %50, %cst_36 [1] : vector<8x8xf32> to vector<8xf32>
    %52 = vector.shape_cast %51 : vector<8xf32> to vector<8x1xf32>
    %53 = vector.broadcast %52 : vector<8x1xf32> to vector<8x8xf32>
    %54 = arith.subf %50, %53 : vector<8x8xf32>
    %55 = math.exp %54 : vector<8x8xf32>
    %cst_37 = arith.constant dense<0.000000e+00> : vector<8xf32>
    %56 = vector.multi_reduction <add>, %55, %cst_37 [1] : vector<8x8xf32> to vector<8xf32>
    %57 = vector.shape_cast %56 : vector<8xf32> to vector<8x1xf32>
    %58 = tpu.reciprocal %57 : vector<8x1xf32> -> vector<8x1xf32>
    %59 = vector.broadcast %58 : vector<8x1xf32> to vector<8x8xf32>
    %60 = arith.mulf %55, %59 : vector<8x8xf32>
    %cst_38 = arith.constant dense<0.000000e+00> : vector<8x8xf32>
    %61 = tpu.matmul %60, %48, %cst_38 {dimension_numbers = #tpu.dot_dimension_numbers<[1], [0], [0], [1], [0, 0, 1, 1], [], []>} : vector<8x8xf32>, vector<8x8xf32>, vector<8x8xf32> -> vector<8x8xf32>
    %62 = vector.extract_strided_slice %26 {offsets = [0, 8], sizes = [8, 8], strides = [1, 1]} : vector<8x32xf32> to vector<8x8xf32>
    %63 = vector.extract_strided_slice %27 {offsets = [0, 8], sizes = [8, 8], strides = [1, 1]} : vector<8x32xf32> to vector<8x8xf32>
    %64 = vector.extract_strided_slice %30 {offsets = [0, 8], sizes = [8, 8], strides = [1, 1]} : vector<8x32xf32> to vector<8x8xf32>
    %cst_39 = arith.constant dense<0.000000e+00> : vector<8x8xf32>
    %65 = tpu.matmul %62, %63, %cst_39 {dimension_numbers = #tpu.dot_dimension_numbers<[1], [1], [0], [0], [0, 0, 1, 0], [], []>} : vector<8x8xf32>, vector<8x8xf32>, vector<8x8xf32> -> vector<8x8xf32>
    %66 = arith.addf %65, %12 : vector<8x8xf32>
    %cst_40 = arith.constant dense<0xFF800000> : vector<8xf32>
    %67 = vector.multi_reduction <maximumf>, %66, %cst_40 [1] : vector<8x8xf32> to vector<8xf32>
    %68 = vector.shape_cast %67 : vector<8xf32> to vector<8x1xf32>
    %69 = vector.broadcast %68 : vector<8x1xf32> to vector<8x8xf32>
    %70 = arith.subf %66, %69 : vector<8x8xf32>
    %71 = math.exp %70 : vector<8x8xf32>
    %cst_41 = arith.constant dense<0.000000e+00> : vector<8xf32>
    %72 = vector.multi_reduction <add>, %71, %cst_41 [1] : vector<8x8xf32> to vector<8xf32>
    %73 = vector.shape_cast %72 : vector<8xf32> to vector<8x1xf32>
    %74 = tpu.reciprocal %73 : vector<8x1xf32> -> vector<8x1xf32>
    %75 = vector.broadcast %74 : vector<8x1xf32> to vector<8x8xf32>
    %76 = arith.mulf %71, %75 : vector<8x8xf32>
    %cst_42 = arith.constant dense<0.000000e+00> : vector<8x8xf32>
    %77 = tpu.matmul %76, %64, %cst_42 {dimension_numbers = #tpu.dot_dimension_numbers<[1], [0], [0], [1], [0, 0, 1, 1], [], []>} : vector<8x8xf32>, vector<8x8xf32>, vector<8x8xf32> -> vector<8x8xf32>
    %78 = vector.extract_strided_slice %26 {offsets = [0, 16], sizes = [8, 8], strides = [1, 1]} : vector<8x32xf32> to vector<8x8xf32>
    %79 = vector.extract_strided_slice %27 {offsets = [0, 16], sizes = [8, 8], strides = [1, 1]} : vector<8x32xf32> to vector<8x8xf32>
    %80 = vector.extract_strided_slice %30 {offsets = [0, 16], sizes = [8, 8], strides = [1, 1]} : vector<8x32xf32> to vector<8x8xf32>
    %cst_43 = arith.constant dense<0.000000e+00> : vector<8x8xf32>
    %81 = tpu.matmul %78, %79, %cst_43 {dimension_numbers = #tpu.dot_dimension_numbers<[1], [1], [0], [0], [0, 0, 1, 0], [], []>} : vector<8x8xf32>, vector<8x8xf32>, vector<8x8xf32> -> vector<8x8xf32>
    %82 = arith.addf %81, %12 : vector<8x8xf32>
    %cst_44 = arith.constant dense<0xFF800000> : vector<8xf32>
    %83 = vector.multi_reduction <maximumf>, %82, %cst_44 [1] : vector<8x8xf32> to vector<8xf32>
    %84 = vector.shape_cast %83 : vector<8xf32> to vector<8x1xf32>
    %85 = vector.broadcast %84 : vector<8x1xf32> to vector<8x8xf32>
    %86 = arith.subf %82, %85 : vector<8x8xf32>
    %87 = math.exp %86 : vector<8x8xf32>
    %cst_45 = arith.constant dense<0.000000e+00> : vector<8xf32>
    %88 = vector.multi_reduction <add>, %87, %cst_45 [1] : vector<8x8xf32> to vector<8xf32>
    %89 = vector.shape_cast %88 : vector<8xf32> to vector<8x1xf32>
    %90 = tpu.reciprocal %89 : vector<8x1xf32> -> vector<8x1xf32>
    %91 = vector.broadcast %90 : vector<8x1xf32> to vector<8x8xf32>
    %92 = arith.mulf %87, %91 : vector<8x8xf32>
    %cst_46 = arith.constant dense<0.000000e+00> : vector<8x8xf32>
    %93 = tpu.matmul %92, %80, %cst_46 {dimension_numbers = #tpu.dot_dimension_numbers<[1], [0], [0], [1], [0, 0, 1, 1], [], []>} : vector<8x8xf32>, vector<8x8xf32>, vector<8x8xf32> -> vector<8x8xf32>
    %94 = vector.extract_strided_slice %26 {offsets = [0, 24], sizes = [8, 8], strides = [1, 1]} : vector<8x32xf32> to vector<8x8xf32>
    %95 = vector.extract_strided_slice %27 {offsets = [0, 24], sizes = [8, 8], strides = [1, 1]} : vector<8x32xf32> to vector<8x8xf32>
    %96 = vector.extract_strided_slice %30 {offsets = [0, 24], sizes = [8, 8], strides = [1, 1]} : vector<8x32xf32> to vector<8x8xf32>
    %cst_47 = arith.constant dense<0.000000e+00> : vector<8x8xf32>
    %97 = tpu.matmul %94, %95, %cst_47 {dimension_numbers = #tpu.dot_dimension_numbers<[1], [1], [0], [0], [0, 0, 1, 0], [], []>} : vector<8x8xf32>, vector<8x8xf32>, vector<8x8xf32> -> vector<8x8xf32>
    %98 = arith.addf %97, %12 : vector<8x8xf32>
    %cst_48 = arith.constant dense<0xFF800000> : vector<8xf32>
    %99 = vector.multi_reduction <maximumf>, %98, %cst_48 [1] : vector<8x8xf32> to vector<8xf32>
    %100 = vector.shape_cast %99 : vector<8xf32> to vector<8x1xf32>
    %101 = vector.broadcast %100 : vector<8x1xf32> to vector<8x8xf32>
    %102 = arith.subf %98, %101 : vector<8x8xf32>
    %103 = math.exp %102 : vector<8x8xf32>
    %cst_49 = arith.constant dense<0.000000e+00> : vector<8xf32>
    %104 = vector.multi_reduction <add>, %103, %cst_49 [1] : vector<8x8xf32> to vector<8xf32>
    %105 = vector.shape_cast %104 : vector<8xf32> to vector<8x1xf32>
    %106 = tpu.reciprocal %105 : vector<8x1xf32> -> vector<8x1xf32>
    %107 = vector.broadcast %106 : vector<8x1xf32> to vector<8x8xf32>
    %108 = arith.mulf %103, %107 : vector<8x8xf32>
    %cst_50 = arith.constant dense<0.000000e+00> : vector<8x8xf32>
    %109 = tpu.matmul %108, %96, %cst_50 {dimension_numbers = #tpu.dot_dimension_numbers<[1], [0], [0], [1], [0, 0, 1, 1], [], []>} : vector<8x8xf32>, vector<8x8xf32>, vector<8x8xf32> -> vector<8x8xf32>
    %110 = tpu.concatenate %61, %77, %93, %109 in 1 : vector<8x8xf32>, vector<8x8xf32>, vector<8x8xf32>, vector<8x8xf32> -> vector<8x32xf32>
    %cst_51 = arith.constant dense<0.000000e+00> : vector<8x32xf32>
    %111 = tpu.matmul %45, %30, %cst_51 {dimension_numbers = #tpu.dot_dimension_numbers<[1], [0], [0], [1], [0, 0, 1, 1], [], []>} : vector<8x8xf32>, vector<8x32xf32>, vector<8x32xf32> -> vector<8x32xf32>
    %112 = arith.addf %110, %111 : vector<8x32xf32>
    %cst_52 = arith.constant dense<0.000000e+00> : vector<8x32xf32>
    %113 = tpu.matmul %112, %20, %cst_52 {dimension_numbers = #tpu.dot_dimension_numbers<[1], [0], [0], [1], [0, 0, 1, 1], [], []>} : vector<8x32xf32>, vector<32x32xf32>, vector<8x32xf32> -> vector<8x32xf32>
    %114 = vector.broadcast %23 : vector<1x32xf32> to vector<8x32xf32>
    %115 = arith.addf %113, %114 : vector<8x32xf32>
    %c0_53 = arith.constant 0 : index
    %c0_54 = arith.constant 0 : index
    %c0_55 = arith.constant 0 : index
    %116 = vector.load %arg8[%c0_53, %c0_54, %c0_55] : memref<1x8x32xf32, #tpu.memory_space<vmem>>, vector<1x8x32xf32>
    %117 = vector.shape_cast %116 : vector<1x8x32xf32> to vector<8x32xf32>
    %118 = vector.shape_cast %115 : vector<8x32xf32> to vector<1x8x32xf32>
    tpu.vector_store %arg8[%c0_53, %c0_54, %c0_55], %118 {strides = array<i32>} : memref<1x8x32xf32, #tpu.memory_space<vmem>>, vector<1x8x32xf32>,
    return
  }
  func.func @transform_0(%arg0: i32) -> (i32, i32, i32) {
    %c0_i32 = arith.constant 0 : i32
    %c0_i32_0 = arith.constant 0 : i32
    %c0_i32_1 = arith.constant 0 : i32
    return %arg0, %c0_i32, %c0_i32_0 : i32, i32, i32
  }
  func.func @transform_1(%arg0: i32) -> (i32, i32, i32) {
    %c0_i32 = arith.constant 0 : i32
    %c0_i32_0 = arith.constant 0 : i32
    %c0_i32_1 = arith.constant 0 : i32
    return %arg0, %c0_i32, %c0_i32_0 : i32, i32, i32
  }
  func.func @transform_2(%arg0: i32) -> (i32, i32, i32) {
    %c0_i32 = arith.constant 0 : i32
    %c0_i32_0 = arith.constant 0 : i32
    %c0_i32_1 = arith.constant 0 : i32
    return %arg0, %c0_i32, %c0_i32_0 : i32, i32, i32
  }
  func.func @transform_3(%arg0: i32) -> (i32, i32, i32) {
    %c0_i32 = arith.constant 0 : i32
    %c0_i32_0 = arith.constant 0 : i32
    %c0_i32_1 = arith.constant 0 : i32
    return %arg0, %c0_i32, %c0_i32_0 : i32, i32, i32
  }
  func.func @transform_4(%arg0: i32) -> (i32, i32, i32) {
    %c0_i32 = arith.constant 0 : i32
    %c0_i32_0 = arith.constant 0 : i32
    %c0_i32_1 = arith.constant 0 : i32
    return %arg0, %c0_i32, %c0_i32_0 : i32, i32, i32
  }
  func.func @transform_5(%arg0: i32) -> (i32, i32, i32) {
    %c0_i32 = arith.constant 0 : i32
    %c0_i32_0 = arith.constant 0 : i32
    %c0_i32_1 = arith.constant 0 : i32
    %c0_i32_2 = arith.constant 0 : i32
    return %c0_i32, %c0_i32_0, %c0_i32_1 : i32, i32, i32
  }
  func.func @transform_6(%arg0: i32) -> (i32, i32) {
    %c0_i32 = arith.constant 0 : i32
    %c0_i32_0 = arith.constant 0 : i32
    %c0_i32_1 = arith.constant 0 : i32
    return %c0_i32, %c0_i32_0 : i32, i32
  }
  func.func @transform_7(%arg0: i32) -> (i32, i32, i32) {
    %c0_i32 = arith.constant 0 : i32
    %c0_i32_0 = arith.constant 0 : i32
    %c0_i32_1 = arith.constant 0 : i32
    return %arg0, %c0_i32, %c0_i32_0 : i32, i32, i32
  }
}

</mosaic_0001>

<bundles_post_ra>
// kernel: tpu_custom_call.1
= control target key start
LH: loop header
LB: loop body
LE: loop exit
PB: predicated region body
PF: predicated region fallthrough
CT: control target
= control target key end

     0   :  { %s2629_s0 = inlined_call_operand.hbm [shape: f32[2,8,32], index: 0, kind: input, shape index: {}]   ;;  %s2630_s1 = inlined_call_operand.hbm [shape: f32[2,8,32], index: 1, kind: input, shape index: {}]   ;;  %s2631_s2 = inlined_call_operand.hbm [shape: f32[2,8,32], index: 2, kind: input, shape index: {}]   ;;  %s2632_s3 = inlined_call_operand.vmem [shape: f32[2,1,8], index: 3, kind: input, shape index: {}]   ;;  %s2633_s4 = inlined_call_operand.hbm [shape: s32[2,8,8], index: 4, kind: input, shape index: {}]   ;;  %s2634_s5 = inlined_call_operand.hbm [shape: f32[4,32,32], index: 5, kind: input, shape index: {}]   ;;  %s2635_s6 = inlined_call_operand.vmem [shape: f32[3,32], index: 6, kind: input, shape index: {}]   ;;  %s2636_s7 = inlined_call_operand.hbm [shape: f32[2,8,32], index: 7, kind: output, shape index: {}]  }
   0x1   :  { %2647 = sst [smem:[#allocation21_spill]] %s2629_s0 }
   0x2   :  { %2648 = sst [smem:[#allocation22_spill]] %s2630_s1 }
   0x3   :  { %2649 = sst [smem:[#allocation23_spill]] %s2634_s5 }
   0x4   :  { %12 = vsyncpa [#allocation3], 0 }
   0x5   :  { %14 = vsyncpa [#allocation3 + $0x1], 0 }
   0x6   :  { %15 = vsyncpa [#allocation6], 0 }
   0x7   :  { %17 = vsyncpa [#allocation6 + $0x1], 0 }
   0x8   :  { %18 = vsyncpa [#allocation9], 0 }
   0x9   :  { %20 = vsyncpa [#allocation9 + $0x1], 0 }
   0xa   :  { %21 = vsyncpa [#allocation4], 0 }
   0xb   :  { %23 = vsyncpa [#allocation4 + $0x1], 0  ;;  %s2244_s24 = smov 0   ;;  %s2246_s25 = smov 0  }
   0xc   :  { %s2248_s26 = smov 0   ;;  %s2250_s27 = smov 0  }
   0xd LB: > { %2650 = sst [smem:[#allocation17_spill]] %s2174_s24  ;;  %s2265_s28 = sadd.s32 4294967295, %s2186_s27   ;;  %s2186_s27 = sphi %s2250_s27, %s2676_s27   ;;  %s2182_s26 = sphi %s2248_s26, %s2680_s26   ;;  %s2178_s25 = sphi %s2246_s25, %s2679_s25   ;;  %s2174_s24 = sphi %s2244_s24, %s2678_s24  }
   0xe   : > { %s1699_s29 = sadd.s32 4294967294, %s2186_s27   ;;  %p49_p0 = scmp.ne.s32.totalorder %s2178_s25, %s2174_s24 }
   0xf   : > { %p2639_p1 = scmp.eq.s32.totalorder %s2265_s28, 0  ;;  %p225_p3 = scmp.eq.s32.totalorder %s1699_s29, 1 }
  0x10   : > { %p1700_p5 = scmp.ge.s32.totalorder %s2186_s27, 1  ;;  %p232_p7 = scmp.lt.s32.totalorder %s2186_s27, 3 }
  0x11   : > { %p2274_p4 = por %p2639_p1, %p49_p0  ;;  %p2279_p6 = por %p225_p3, %p49_p0 }
  0x12   : > { %p2284_p8 = pnand %p1700_p5, %p232_p7  ;;  %s2188_s10 = smov [#allocation10]  }
  0x13   : > { %s2651_s30 = scalar_select %p2274_p4, 1, 0 }
  0x14   : > { %s2652_s8 = scalar_select %p2279_p6, 1, 0 }
  0x15   : > { %s2654_s9 = scalar_select %p2284_p8, 1, 0 }
  0x16   : > { %2653 = sst [smem:[#allocation18_spill]] %s2652_s8  ;;  %s244_s11 = sshll.u32 %s2188_s10, 4  ;;  %s245_s11 = int_to_ptr.vmem [resolvable:$true] %s244_s11 }
  0x17   : > { %p1884_p9 = pneg %p2284_p8  ;;  %s2298_s13 = sadd.s32 1, %s2186_s27  }
  0x18   : > { %2656 = sst [smem:[#allocation19_spill]] %s2298_s13  ;;  %s36_s14 = sadd.s32 1, %s2182_s26 }
  0x19   : > { %p2293_p11 = pnand %p1884_p9, %p2639_p1  ;;  %s33_s15 = ssub.s32 %s2186_s27, %s2298_s13 }
  0x1a   : > { %s1983_s16 = scalar_lea.vmem %s245_s11, 2048  ;;  %p1991_p5 = scmp.lt.s32.totalorder %s245_s11, %s245_s11 }
  0x1b   : > { %p1974_p12 = pneg %p2293_p11  ;;  %p1984_p13 = scmp.ne.s32.totalorder %s245_s11, %s1983_s16 }
  0x1c   : > { %p1992_p7 = scmp.lt.s32.totalorder %s1983_s16, %s1983_s16 }
  0x1d   : > { %p1986_p0 = pnand %p1984_p13, %p1974_p12 }
  0x1e   : > { %p1993_p10 = por %p1992_p7, %p1991_p5 }
  0x1f   : > { %p1987_p3 = pneg %p1986_p0 }
  0x21   : > { %p1994_p2 = pnand %p1993_p10, %p1987_p3 }
  0x23   : > { %1997 = shalt.err (!%p1994_p2)
}
  0x24   : > { %s2189_s17 = smov 128   ;;  %s2190_s18 = smov 8  }
  0x25   : > { %s2657_s5 = sld [smem:[#allocation23_spill]]  ;;  %p34_p9 = scmp.eq.s32.totalorder %s33_s15, 0 }
  0x26   : > { %p43_p2 = scmp.ne.s32.totalorder %s2182_s26, %s2178_s25  ;;  %p44_p10 = scmp.eq.s32.totalorder %s2186_s27, 0 }
  0x27   : > { %p1906_p12 = scmp.lt.s32.totalorder %s2186_s27, 2  ;;  %p2659_p0 = scmp.eq.s32.totalorder %s2265_s28, 1 }
  0x28   : > { %s2315_s21 = scalar_select %p34_p9, %s2182_s26, %s36_s14  }
  0x29   : > { %p45_p13 = por %p44_p10, %p43_p2  ;;  %p2319_p3 = por %p2659_p0, %p43_p2 }
  0x2a   : > { %2658 = sst [smem:[#allocation20_spill]] %s2315_s21  ;;  %s2637_s23 = sand.u32 1, %s2182_s26  }
  0x2b   : > { %1887 = dma.hbm_to_vmem [thread:$0]  (!%p2293_p11), %s2657_s5, 2048, %s245_s11, [#allocation9], %s2189_s17, %s2189_s17, %s2190_s18  }
  0x2c   : > { %s2660_s22 = scalar_select %p2319_p3, 1, 0 }
  0x2d   : > { %s2325_s29 = sshll.u32 %s2186_s27, 7  ;;  %s2329_s10 = sshll.u32 %s2637_s23, 3 }
  0x2e   : > { %p2331_p11 = pnand %p1906_p12, %p45_p13  ;;  %s2638_s12 = sand.u32 1, %s2186_s27  }
  0x2f   : > { %s2662_s1 = sld [smem:[#allocation22_spill]]  ;;  %s283_s17 = scalar_lea.vmem [#allocation5], %s2329_s10 }
  0x30   : > { %s290_s18 = sshll.u32 %s283_s17, 4  ;;  %s2345_s19 = scalar_lea.sflag [#allocation6], %s2638_s12  ;;  %s291_s18 = int_to_ptr.vmem [resolvable:$true] %s290_s18 }
  0x31   : > { %p2351_p7 = pneg %p2331_p11 }
  0x35   : > { %s2340_s16 = scalar_lea.hbm %s2662_s1, %s2325_s29  ;;  %s2003_s5 = scalar_lea.hbm %s2662_s1, 256 }
  0x36   : > { %s1998_s20 = scalar_lea.hbm %s2340_s16, 128  ;;  %p2004_p10 = scmp.lt.s32.totalorder %s2340_s16, %s2662_s1 }
  0x37   : > { %p1999_p5 = scmp.ne.s32.totalorder %s2340_s16, %s1998_s20  ;;  %p2005_p12 = scmp.lt.s32.totalorder %s2003_s5, %s1998_s20 }
  0x39   : > { %p2001_p9 = pnand %p2351_p7, %p1999_p5  ;;  %p2006_p13 = por %p2005_p12, %p2004_p10 }
  0x3b   : > { %p2002_p2 = pneg %p2001_p9 }
  0x3d   : > { %p2007_p0 = pnand %p2006_p13, %p2002_p2 }
  0x3f   : > { %2010 = shalt.err (!%p2007_p0)
}
  0x40   : > { %s2011_s12 = scalar_lea.vmem %s291_s18, 128  ;;  %s2191_s13 = smov [#allocation5]  }
  0x41   : > { %p2012_p1 = scmp.ne.s32.totalorder %s291_s18, %s2011_s12  ;;  %s2016_s8 = sshll.u32 %s2191_s13, 4  ;;  %s2017_s8 = int_to_ptr.vmem [resolvable:$false] %s2016_s8 }
  0x42   : > { %s2018_s24 = scalar_lea.vmem %s2017_s8, 256  ;;  %p2019_p5 = scmp.lt.s32.totalorder %s291_s18, %s2017_s8 }
  0x43   : > { %p2014_p6 = pnand %p2012_p1, %p2351_p7  ;;  %p2020_p9 = scmp.lt.s32.totalorder %s2018_s24, %s2011_s12 }
  0x45   : > { %p2015_p3 = pneg %p2014_p6  ;;  %p2021_p4 = por %p2020_p9, %p2019_p5 }
  0x47   : > { %p2022_p8 = pnand %p2021_p4, %p2015_p3 }
  0x49   : > { %2025 = shalt.err (!%p2022_p8)
}
  0x4a   : > { %1894 = dma.hbm_to_vmem [thread:$0]  (!%p2331_p11), %s2340_s16, 128, %s291_s18, %s2345_s19  }
  0x4b   : > { %s2664_s0 = sld [smem:[#allocation21_spill]]  ;;  %s265_s24 = scalar_lea.vmem [#allocation2], %s2329_s10 }
  0x4c   : > { %s272_s8 = sshll.u32 %s265_s24, 4  ;;  %s2665_s12 = sand.u32 1, %s2182_s26   ;;  %s273_s8 = int_to_ptr.vmem [resolvable:$true] %s272_s8 }
  0x4d   : > { %s262_s20 = scalar_lea.sflag [#allocation3], %s2665_s12 }
  0x51   : > { %s2374_s13 = scalar_lea.hbm %s2664_s0, %s2325_s29  ;;  %s2031_s18 = scalar_lea.hbm %s2664_s0, 256 }
  0x52   : > { %s2026_s14 = scalar_lea.hbm %s2374_s13, 128  ;;  %p2032_p8 = scmp.lt.s32.totalorder %s2374_s13, %s2664_s0 }
  0x53   : > { %p2027_p1 = scmp.ne.s32.totalorder %s2374_s13, %s2026_s14  ;;  %p2033_p3 = scmp.lt.s32.totalorder %s2031_s18, %s2026_s14 }
  0x55   : > { %p2029_p4 = pnand %p2027_p1, %p2351_p7  ;;  %p2034_p2 = por %p2033_p3, %p2032_p8 }
  0x57   : > { %p2030_p6 = pneg %p2029_p4 }
  0x59   : > { %p2035_p10 = pnand %p2034_p2, %p2030_p6 }
  0x5b   : > { %2038 = shalt.err (!%p2035_p10)
}
  0x5c   : > { %s2039_s21 = scalar_lea.vmem %s273_s8, 128  ;;  %s2192_s24 = smov [#allocation2]  }
  0x5d   : > { %p2040_p12 = scmp.ne.s32.totalorder %s273_s8, %s2039_s21  ;;  %s2044_s12 = sshll.u32 %s2192_s24, 4  ;;  %s2045_s12 = int_to_ptr.vmem [resolvable:$false] %s2044_s12 }
  0x5e   : > { %s2046_s1 = scalar_lea.vmem %s2045_s12, 256  ;;  %p2047_p5 = scmp.lt.s32.totalorder %s273_s8, %s2045_s12 }
  0x5f   : > { %p2042_p13 = pnand %p2040_p12, %p2351_p7  ;;  %p2048_p9 = scmp.lt.s32.totalorder %s2046_s1, %s2039_s21 }
  0x61   : > { %p2043_p0 = pneg %p2042_p13  ;;  %p2049_p1 = por %p2048_p9, %p2047_p5 }
  0x63   : > { %p2050_p4 = pnand %p2049_p1, %p2043_p0 }
  0x65   : > { %2053 = shalt.err (!%p2050_p4)
}
  0x66   : > { %1891 = dma.hbm_to_vmem [thread:$0]  (!%p2331_p11), %s2374_s13, 128, %s273_s8, %s262_s20  }
  0x67   : > { %s306_s16 = scalar_lea.hbm %s2631_s2, %s2325_s29  ;;  %s301_s18 = scalar_lea.vmem [#allocation7], %s2329_s10 }
  0x68   : > { %s308_s17 = sshll.u32 %s301_s18, 4  ;;  %s2054_s5 = scalar_lea.hbm %s306_s16, 128  ;;  %s309_s17 = int_to_ptr.vmem [resolvable:$true] %s308_s17 }
  0x69   : > { %p2055_p6 = scmp.ne.s32.totalorder %s306_s16, %s2054_s5  ;;  %s2059_s24 = scalar_lea.hbm %s2631_s2, 256 }
  0x6a   : > { %p2060_p2 = scmp.lt.s32.totalorder %s306_s16, %s2631_s2  ;;  %p2061_p10 = scmp.lt.s32.totalorder %s2059_s24, %s2054_s5 }
  0x6b   : > { %p2057_p8 = pnand %p2055_p6, %p2351_p7 }
  0x6c   : > { %p2062_p12 = por %p2061_p10, %p2060_p2 }
  0x6d   : > { %p2058_p3 = pneg %p2057_p8 }
  0x6f   : > { %p2063_p13 = pnand %p2062_p12, %p2058_p3 }
  0x71   : > { %2066 = shalt.err (!%p2063_p13)
}
  0x72   : > { %s2067_s13 = scalar_lea.vmem %s309_s17, 128  ;;  %s2193_s8 = smov [#allocation7]  }
  0x73   : > { %p2068_p0 = scmp.ne.s32.totalorder %s309_s17, %s2067_s13  ;;  %s2072_s20 = sshll.u32 %s2193_s8, 4  ;;  %s2073_s20 = int_to_ptr.vmem [resolvable:$false] %s2072_s20 }
  0x74   : > { %s2074_s14 = scalar_lea.vmem %s2073_s20, 256  ;;  %p2075_p1 = scmp.lt.s32.totalorder %s309_s17, %s2073_s20 }
  0x75   : > { %p2070_p5 = pnand %p2068_p0, %p2351_p7  ;;  %p2076_p4 = scmp.lt.s32.totalorder %s2074_s14, %s2067_s13 }
  0x77   : > { %p2071_p9 = pneg %p2070_p5  ;;  %p2077_p6 = por %p2076_p4, %p2075_p1 }
  0x79   : > { %p2078_p8 = pnand %p2077_p6, %p2071_p9 }
  0x7b   : > { %2081 = shalt.err (!%p2078_p8)
}
  0x7c   : > { %1897 = dma.hbm_to_vmem [thread:$0]  (!%p2331_p11), %s306_s16, 128, %s309_s17, %s2345_s19  }
  0x7d   : > { %s2417_s18 = scalar_lea.hbm %s2633_s4, %s2325_s29  ;;  %s325_s5 = scalar_lea.vmem [#allocation8], %s2329_s10 }
  0x7e   : > { %s332_s1 = sshll.u32 %s325_s5, 4  ;;  %s2666_s21 = sand.u32 1, %s2186_s27   ;;  %s333_s1 = int_to_ptr.vmem [resolvable:$true] %s332_s1 }
  0x7f   : > { %s322_s24 = scalar_lea.sflag [#allocation9], %s2666_s21  ;;  %s2082_s12 = scalar_lea.hbm %s2417_s18, 128 }
  0x80   : > { %p2083_p3 = scmp.ne.s32.totalorder %s2417_s18, %s2082_s12  ;;  %s2087_s16 = scalar_lea.hbm %s2633_s4, 256 }
  0x81   : > { %p2088_p12 = scmp.lt.s32.totalorder %s2417_s18, %s2633_s4  ;;  %p2089_p13 = scmp.lt.s32.totalorder %s2087_s16, %s2082_s12 }
  0x82   : > { %p2085_p2 = pnand %p2083_p3, %p2351_p7 }
  0x83   : > { %p2090_p0 = por %p2089_p13, %p2088_p12 }
  0x84   : > { %p2086_p10 = pneg %p2085_p2 }
  0x86   : > { %p2091_p5 = pnand %p2090_p0, %p2086_p10 }
  0x88   : > { %2094 = shalt.err (!%p2091_p5)
}
  0x89   : > { %s2095_s10 = scalar_lea.vmem %s333_s1, 128  ;;  %s2194_s8 = smov [#allocation8]  }
  0x8a   : > { %p2096_p9 = scmp.ne.s32.totalorder %s333_s1, %s2095_s10  ;;  %s2100_s20 = sshll.u32 %s2194_s8, 4  ;;  %s2101_s20 = int_to_ptr.vmem [resolvable:$false] %s2100_s20 }
  0x8b   : > { %s2102_s14 = scalar_lea.vmem %s2101_s20, 256  ;;  %p2103_p6 = scmp.lt.s32.totalorder %s333_s1, %s2101_s20 }
  0x8c   : > { %p2098_p1 = pnand %p2096_p9, %p2351_p7  ;;  %p2104_p8 = scmp.lt.s32.totalorder %s2102_s14, %s2095_s10 }
  0x8e   : > { %p2099_p4 = pneg %p2098_p1  ;;  %p2105_p3 = por %p2104_p8, %p2103_p6 }
  0x90   : > { %p2106_p2 = pnand %p2105_p3, %p2099_p4 }
  0x92   : > { %2109 = shalt.err (!%p2106_p2)
}
  0x93   : > { %1900 = dma.hbm_to_vmem [thread:$0]  (!%p2331_p11), %s2417_s18, 128, %s333_s1, %s322_s24  }
  0x94   : > { %p2667_p10 = scmp.ne.s32.totalorder %s2654_s9, 0 }
  0x95   : > { %s2441_s23 = sand.u32 (!%p2667_p10), 1, %s2178_s25   ;;  %p2668_p7 = scmp.ne.s32.totalorder (!%p2667_p10), %s2651_s30, 0 }
  0x96   : > { %341 = sbr.rel (%p2667_p10) target bundleno = 1567 (0x61f), region = 48  ;;  %s2444_s0 = sshll.u32 (!%p2667_p10), %s2441_s23, 3 }
  0x97   : > { %s344_s15 = scalar_lea.sflag (!%p2667_p10), [#allocation3], %s2441_s23  ;;  %s347_s5 = scalar_lea.vmem (!%p2667_p10), [#allocation2], %s2444_s0 }
  0x9b   : > { %2153 = dma.done.wait (%p2668_p7), %s344_s15, 128  }
  0x9c   : > { %2155 = vsyncadd (%p2668_p7), %s344_s15, 4294967168  ;;  %s352_s9 = sand.u32 1, %s2265_s28   ;;  %s356_s18 = scalar_lea.vmem [#allocation5], %s2444_s0 }
  0x9d   : > { %s353_s11 = scalar_lea.sflag [#allocation6], %s352_s9 }
  0x9e   : > { %2157 = dma.done.wait (%p2668_p7), %s353_s11, 256  }
  0x9f   : > { %2159 = vsyncadd (%p2668_p7), %s353_s11, 4294967040  ;;  %s365_s1 = scalar_lea.vmem [#allocation7], %s2444_s0  ;;  %s371_s21 = scalar_lea.sflag [#allocation9], %s352_s9 }
  0xa0   : > { %s374_s24 = scalar_lea.vmem [#allocation8], %s2444_s0 }
  0xa1   : > { %2161 = dma.done.wait (%p2668_p7), %s371_s21, 128  }
  0xa2   : > { %2163 = vsyncadd (%p2668_p7), %s371_s21, 4294967168  ;;  %p2669_p11 = scmp.eq.s32.totalorder %s2265_s28, 0 }
  0xa4   : > { %2165 = dma.done.wait (%p2669_p11), [#allocation9], 2048   ;;  %p2670_p12 = pmov %p2669_p11 }
  0xa5   : > { %v2195_v0 = vmov 0.0   ;;  %vm2196_vm0 = vmmov 0   ;;  %v439_v1 = vld [vmem:[#allocation10 + $0x18] sm:$0xff]  ;;  %v438_v3 = vld [vmem:[#allocation10 + $0x10] sm:$0xff]  ;;  %v437_v5 = vld [vmem:[#allocation10 + $0x8] sm:$0xff]  ;;  %vm462_vm1 = vcmask 261120  }
  0xa6   : > { %2167 = vsyncadd (%p2670_p12), [#allocation9], 4294965248  ;;  %1781 = vmatprep.subr.mxu0 %v2195_v0  ;;  %1792 = vmatprep.subr.mxu1 %v2195_v0  ;;  %v444_v2 = vld [vmem:[#allocation10 + $0x38] sm:$0xff]  ;;  %v443_v4 = vld [vmem:[#allocation10 + $0x30] sm:$0xff]  ;;  %vm694_vm2 = vcmask 64512   ;;  %s2197_s13 = smov 112  }
  0xa7   : > { %1789 = vmatprep.mubr.msk.f32.mxu0 %vm2196_vm0, %v2195_v0  ;;  %1800 = vmatprep.mubr.msk.f32.mxu1 %vm2196_vm0, %v2195_v0  ;;  %v442_v6 = vld [vmem:[#allocation10 + $0x28] sm:$0xff]  ;;  %v436_v7 = vld [vmem:[#allocation10] sm:$0xff]  ;;  %v431_v10 = vld [vmem:[%s356_s18] sm:$0xff]  ;;  %s2198_s19 = smov 120   ;;  %s2199_s16 = smov 104   ;;  %vm1375_vm4 = vcmask 130048  }
  0xa8   : > { %1782 = vmatpush3.msra.mxu0 %v439_v1  ;;  %1793 = vmatpush3.msra.mxu1 %v444_v2  ;;  %v441_v8 = vld [vmem:[#allocation10 + $0x20] sm:$0xff]  ;;  %v449_v11 = vld [vmem:[#allocation10 + $0x58] sm:$0xff]  ;;  %v448_v12 = vld [vmem:[#allocation10 + $0x50] sm:$0xff]  ;;  %p427_p13 = scmp.lt.s32.totalorder %s2265_s28, 1  ;;  %s2200_s15 = smov 8   ;;  %vm1377_vm5 = vcmask 195584  }
  0xa9   : > { %1783 = vmatprep.subr.mxu0 %v2195_v0  ;;  %1794 = vmatprep.subr.mxu1 %v2195_v0  ;;  %v430_v9 = vld [vmem:[%s347_s5] sm:$0xff]  ;;  %v433_v32 = vld [vmem:[%s374_s24] sm:$0xff]  ;;  %s2201_s5 = smov 16   ;;  %s2202_s9 = smov 24  }
  0xaa   : > { %1784 = vmatpush3.msra.mxu0 %v438_v3  ;;  %1795 = vmatpush3.msra.mxu1 %v443_v4  ;;  %v447_v13 = vld [vmem:[#allocation10 + $0x48] sm:$0xff]  ;;  %v446_v14 = vld [vmem:[#allocation10 + $0x40] sm:$0xff]  ;;  %vm434_vm3 = vcmp.eq.s32.totalorder %v433_v32, 1  ;;  %s428_s10 = scalar_select %p427_p13, %s2265_s28, 1 }
  0xab   : > { %1785 = vmatprep.subr.mxu0 %v2195_v0  ;;  %1796 = vmatprep.subr.mxu1 %v2195_v0  ;;  %v432_v15 = vld [vmem:[%s365_s1] sm:$0xff]  ;;  %v435_v33 = vsel %vm434_vm3, -1e+09, %v2195_v0  ;;  %s1740_s1 = sshll.u32 %s2265_s28, 7  ;;  %s426_s21 = scalar_lea.vmem [#allocation11], %s2444_s0 }
  0xac   : > { %1786 = vmatpush3.msra.mxu0 %v437_v5  ;;  %1797 = vmatpush3.msra.mxu1 %v442_v6  ;;  %v1718_v16 = vld [vmem:[%s2635_s6] ss:$0 sm:$0xff]  ;;  %v1721_v22 = vld [vmem:[%s2635_s6 + $0x1] ss:$0 sm:$0xff]  ;;  %s429_s14 = scalar_lea.vmem %s2632_s3, %s428_s10  ;;  %s1545_s24 = sshll.u32 %s426_s21, 4  ;;  %s1546_s24 = int_to_ptr.vmem [resolvable:$true] %s1545_s24 }
  0xad   : > { %1787 = vmatprep.subr.mxu0 %v2195_v0  ;;  %1798 = vmatprep.subr.mxu1 %v2195_v0  ;;  %v1723_v38 = vld [vmem:[%s429_s14] ss:$0 sm:$0xff]  ;;  %p2671_p5 = scmp.ne.s32.totalorder %s2660_s22, 0  ;;  %s2203_s28 = smov [#allocation11]  }
  0xae   : > { %1788 = vmatpush3.msra.mxu0 %v436_v7  ;;  %1799 = vmatpush3.msra.mxu1 %v441_v8  ;;  %v693_v41 = vadd.f32 %v1723_v38, %v435_v33  ;;  %s2114_s0 = sshll.u32 %s2203_s28, 4  ;;  %s2115_s0 = int_to_ptr.vmem [resolvable:$false] %s2114_s0 }
  0xaf   : > { %1790 = vmatmul.mubr.msk.f32.vlgmr.msra.gmra.mxu0 %vm462_vm1, %v430_v9  ;;  %1801 = vmatmul.mubr.msk.f32.vlgmr.msra.gmra.mxu1 %vm462_vm1, %v431_v10  ;;  %s2116_s17 = scalar_lea.vmem %s2115_s0, 256  ;;  %p2117_p4 = scmp.lt.s32.totalorder %s1546_s24, %s2115_s0 }
  0xb0   : > { %1814 = vmatprep.subr.mxu1 %v2195_v0  ;;  %1816 = vmatprep.mubr.msk.f32.mxu1 %vm2196_vm0, %v2195_v0  ;;  %v695_v46 = vsel %vm694_vm2, %v693_v41, -inf }
  0xb1   : > { %1803 = vmatprep.subr.mxu0 %v2195_v0  ;;  %1811 = vmatprep.mubr.msk.f32.mxu0 %vm2196_vm0, %v2195_v0 }
  0xb2   : > { %1804 = vmatpush3.msra.mxu0 %v449_v11 }
  0xb3   : > { %1805 = vmatprep.subr.mxu0 %v2195_v0 }
  0xb4   : > { %1806 = vmatpush3.msra.mxu0 %v448_v12 }
  0xb5   : > { %1807 = vmatprep.subr.mxu0 %v2195_v0 }
  0xb6   : > { %1808 = vmatpush3.msra.mxu0 %v447_v13 }
  0xb7   : > { %1809 = vmatprep.subr.mxu0 %v2195_v0 }
  0xb8   : > { %1810 = vmatpush3.msra.mxu0 %v446_v14 }
  0xb9   : > { %1812 = vmatmul.mubr.msk.f32.vlgmr.msra.gmra.mxu0 %vm462_vm1, %v432_v15  ;;  %1824 = vmatprep.subr.mxu0 %v2195_v0 }
  0xba   : > { %1826 = vmatprep.mubr.msk.f32.mxu0 %vm2196_vm0, %v2195_v0 }
 0x16f   : > { %v532_v17 = vpop.f32.mrf.mxu0  ;;  %v605_v18 = vpop.f32.mrf.mxu1 }
 0x170   : > { %v533_v19 = vadd.f32 %v1718_v16, %v532_v17  ;;  %1034 = vrot.lane.b32.xlu1 %v605_v18, %s2197_s13  ;;  %868 = vrot.lane.b32.xlu0 %v605_v18, %s2198_s19 }
 0x171   : > { %1815 = vmatpush3.xpose.msk.msra.mxu1 %vm694_vm2, %v605_v18  ;;  %v1791_v20 = vpop.f32.mrf.mxu0  ;;  %v1802_v21 = vpop.f32.mrf.mxu1 }
 0x172   : > { %1819 = vmatprep.subr.mxu1 %v2195_v0 }
 0x174   : > { %1817 = vmatmul.mubr.msk.f32.vlgmr.msra.gmra.mxu1 %vm694_vm2, %v533_v19  ;;  %1032 = vrot.lane.b32.xlu1 %v533_v19, %s2197_s13 }
 0x175   : > { %866 = vrot.lane.b32.xlu0 %v533_v19, %s2198_s19  ;;  %1821 = vmatprep.mubr.msk.f32.mxu1 %vm2196_vm0, %v2195_v0 }
 0x178   : > { %1197 = vrot.lane.b32.xlu1 %v533_v19, %s2199_s16 }
 0x179   : > { %1199 = vrot.lane.b32.xlu0 %v605_v18, %s2199_s16  ;;  %v682_v23 = vpop.f32.mrf.mxu0 }
 0x17a   : > { %v2518_v24 = vadd.f32 %v1721_v22, %v682_v23 }
 0x17b   : > { %v1813_v25 = vpop.f32.mrf.mxu0 }
 0x17c   : > { %1820 = vmatpush3.msra.mxu1 %v2518_v24 }
 0x17d   : > { %1829 = vmatprep.subr.mxu1 %v2195_v0 }
 0x1e2   : > { %v869_v26 = vpop.permute.xlu0 %868  ;;  %v1035_v27 = vpop.permute.xlu1 %1034 }
 0x1e3   : > { %1825 = vmatpush3.xpose.msk.msra.mxu0 %vm694_vm2, %v869_v26 }
 0x1e4   : > { %1834 = vmatprep.subr.mxu0 %v2195_v0 }
 0x1e6   : > { %v1033_v29 = vpop.permute.xlu1 %1032 }
 0x1e7   : > { %v867_v28 = vpop.permute.xlu0 %866 }
 0x1e8   : > { %1827 = vmatmul.mubr.msk.f32.vlgmr.msra.gmra.mxu0 %vm694_vm2, %v867_v28 }
 0x1e9   : > { %1835 = vmatpush3.xpose.msk.msra.mxu0 %vm694_vm2, %v1035_v27  ;;  %1836 = vmatprep.mubr.msk.f32.mxu0 %vm2196_vm0, %v2195_v0 }
 0x1ea   : > { %1844 = vmatprep.subr.mxu0 %v2195_v0  ;;  %v1198_v31 = vpop.permute.xlu1 %1197 }
 0x1eb   : > { %v1200_v30 = vpop.permute.xlu0 %1199 }
 0x1ec   : > { %1837 = vmatmul.mubr.msk.f32.vlgmr.msra.gmra.mxu0 %vm694_vm2, %v1033_v29 }
 0x1ed   : > { %1845 = vmatpush3.xpose.msk.msra.mxu0 %vm694_vm2, %v1200_v30  ;;  %1846 = vmatprep.mubr.msk.f32.mxu0 %vm2196_vm0, %v2195_v0 }
 0x1ee   : > { %1854 = vmatprep.subr.mxu0 %v2195_v0 }
 0x1f0   : > { %1847 = vmatmul.mubr.msk.f32.vlgmr.msra.gmra.mxu0 %vm694_vm2, %v1198_v31 }
 0x1f1   : > { %1855 = vmatpush3.msra.mxu0 %v2518_v24  ;;  %1856 = vmatprep.mubr.msk.f32.mxu0 %vm2196_vm0, %v2195_v0 }
 0x234   : > { %v778_v34 = vpop.f32.mrf.mxu1 }
 0x235   : > { %v779_v35 = vadd.f32 %v778_v34, %v435_v33 }
 0x236   : > { %v1818_v36 = vpop.f32.mrf.mxu1 }
 0x237   : > { %v782_v37 = vsel %vm694_vm2, %v779_v35, -inf  ;;  %v453_v36 = vld [vmem:[#allocation10 + $0x70] sm:$0xff] }
 0x238   : > { %783 = vmax.xlane.f32.xlu0 %v782_v37 }
 0x2a8   : > { %v940_v39 = vpop.f32.mrf.mxu0 }
 0x2a9   : > { %v941_v40 = vadd.f32 %v940_v39, %v435_v33 }
 0x2aa   : > { %v1828_v42 = vpop.f32.mrf.mxu0 }
 0x2ab   : > { %v944_v43 = vsel %vm694_vm2, %v941_v40, -inf  ;;  %v451_v42 = vld [vmem:[#allocation10 + $0x60] sm:$0xff] }
 0x2ac   : > { %945 = vmax.xlane.f32.xlu1 %v944_v43  ;;  %v1106_v44 = vpop.f32.mrf.mxu0 }
 0x2ad   : > { %v1107_v45 = vadd.f32 %v1106_v44, %v435_v33 }
 0x2ae   : > { %v1838_v47 = vpop.f32.mrf.mxu0 }
 0x2af   : > { %v1110_v48 = vsel %vm694_vm2, %v1107_v45, -inf }
 0x2b0   : > { %1111 = vmax.xlane.f32.xlu0 %v1110_v48  ;;  %v1271_v49 = vpop.f32.mrf.mxu0  ;;  %696 = vmax.xlane.f32.xlu1 %v695_v46 }
 0x2b1   : > { %v1272_v50 = vadd.f32 %v1271_v49, %v435_v33 }
 0x2b2   : > { %v1848_v51 = vpop.f32.mrf.mxu0 }
 0x2b3   : > { %v1275_v52 = vsel %vm694_vm2, %v1272_v50, -inf }
 0x2b4   : > { %1276 = vmax.xlane.f32.xlu0 %v1275_v52 }
 0x2c1   : > { %v784_v53 = vpop.xlane.xlu0 %783 }
 0x2c2   : > { %v785_v54 = vsub.f32 %v779_v35, %v784_v53  ;;  %v454_v35 = vld [vmem:[#allocation10 + $0x78] sm:$0xff]  ;;  %v1737_v53 = vld [vmem:[%s2635_s6 + $0x2] ss:$0 sm:$0xff] }
 0x2c4   : > { %v786_v55 = vmul.f32 1.442695, %v785_v54 }
 0x2c6   : > { %1952 = vpow2.f32 %v786_v55 }
 0x2d3   : > { %v1953_v56 = vpop.eup %1952 }
 0x2d4   : > { %v788_v57 = vsel %vm694_vm2, %v1953_v56, 0.0 }
 0x2d5   : > { %789 = vadd.xlane.f32.xlu0 %v788_v57 }
 0x335   : > { %v946_v58 = vpop.xlane.xlu1 %945 }
 0x336   : > { %v947_v59 = vsub.f32 %v941_v40, %v946_v58 }
 0x338   : > { %v948_v60 = vmul.f32 1.442695, %v947_v59 }
 0x339   : > { %v1112_v61 = vpop.xlane.xlu0 %1111  ;;  %v697_v7 = vpop.xlane.xlu1 %696 }
 0x33a   : > { %1954 = vpow2.f32 %v948_v60  ;;  %v1113_v62 = vsub.f32 %v1107_v45, %v1112_v61  ;;  %v698_v9 = vsub.f32 %v693_v41, %v697_v7  ;;  %v452_v41 = vld [vmem:[#allocation10 + $0x68] sm:$0xff] }
 0x33c   : > { %v1114_v63 = vmul.f32 1.442695, %v1113_v62  ;;  %v699_v11 = vmul.f32 1.442695, %v698_v9 }
 0x33d   : > { %v1277_v5 = vpop.xlane.xlu0 %1276 }
 0x33e   : > { %1956 = vpow2.f32 %v1114_v63  ;;  %v1278_v8 = vsub.f32 %v1272_v50, %v1277_v5 }
 0x340   : > { %v1279_v10 = vmul.f32 1.442695, %v1278_v8 }
 0x347   : > { %v1955_v1 = vpop.eup %1954 }
 0x348   : > { %v950_v2 = vsel %vm694_vm2, %v1955_v1, 0.0 }
 0x349   : > { %951 = vadd.xlane.f32.xlu1 %v950_v2 }
 0x34b   : > { %v1957_v3 = vpop.eup %1956 }
 0x34c   : > { %v1116_v4 = vsel %vm694_vm2, %v1957_v3, 0.0 }
 0x34d   : > { %1117 = vadd.xlane.f32.xlu0 %v1116_v4 }
 0x35a   : > { %1121 = vrot.lane.b32.xlu1 %v2518_v24, %s2197_s13  ;;  %s2591_s13 = scalar_lea.hbm %s2636_s7, %s1740_s1 }
 0x35e   : > { %v790_v6 = vpop.xlane.xlu0 %789 }
 0x35f   : > { %1958 = vrcp.f32 %v790_v6 }
 0x360   : > { %1960 = vpow2.f32 %v1279_v10 }
 0x361   : > { %1962 = vpow2.f32 %v699_v11 }
 0x363   : > { %956 = vrot.lane.b32.xlu0 %v2518_v24, %s2198_s19  ;;  %s1532_s19 = scalar_lea.sflag [#allocation4], %s2441_s23 }
 0x36c   : > { %v1959_v12 = vpop.eup %1958 }
 0x36d   : > { %v792_v13 = vmul.f32 %v1959_v12, %v1953_v56  ;;  %v1961_v14 = vpop.eup %1960 }
 0x36e   : > { %v1963_v15 = vpop.eup %1962  ;;  %v1281_v16 = vsel %vm694_vm2, %v1961_v14, 0.0 }
 0x36f   : > { %1822 = vmatmul.mubr.msk.f32.vlgmr.msra.gmra.mxu1 %vm694_vm2, %v792_v13  ;;  %v701_v17 = vsel %vm694_vm2, %v1963_v15, 0.0 }
 0x370   : > { %1831 = vmatprep.mubr.msk.f32.mxu1 %vm2196_vm0, %v2195_v0 }
 0x37e   : > { %1282 = vadd.xlane.f32.xlu1 %v1281_v16 }
 0x382   : > { %702 = vadd.xlane.f32.xlu0 %v701_v17 }
 0x38f   : > { %1286 = vrot.lane.b32.xlu1 %v2518_v24, %s2199_s16  ;;  %s2110_s16 = scalar_lea.vmem %s1546_s24, 128 }
 0x390   : > { %p2111_p0 = scmp.ne.s32.totalorder %s1546_s24, %s2110_s16  ;;  %p2118_p6 = scmp.lt.s32.totalorder %s2116_s17, %s2110_s16 }
 0x392   : > { %p2112_p9 = pnand %p2111_p0, %p2671_p5  ;;  %p2119_p8 = por %p2118_p6, %p2117_p4 }
 0x394   : > { %p2113_p1 = pneg %p2112_p9 }
 0x396   : > { %p2120_p3 = pnand %p2119_p8, %p2113_p1 }
 0x3d2   : > { %v952_v18 = vpop.xlane.xlu1 %951 }
 0x3d3   : > { %1964 = vrcp.f32 %v952_v18 }
 0x3d6   : > { %v1118_v19 = vpop.xlane.xlu0 %1117  ;;  %v1122_v23 = vpop.permute.xlu1 %1121 }
 0x3d7   : > { %1966 = vrcp.f32 %v1118_v19 }
 0x3da   : > { %v957_v20 = vpop.permute.xlu0 %956 }
 0x3db   : > { %1830 = vmatpush3.msra.mxu1 %v957_v20 }
 0x3dc   : > { %1839 = vmatprep.subr.mxu1 %v2195_v0 }
 0x3e0   : > { %v1965_v21 = vpop.eup %1964 }
 0x3e1   : > { %v954_v22 = vmul.f32 %v1965_v21, %v1955_v1 }
 0x3e3   : > { %1832 = vmatmul.mubr.msk.f32.vlgmr.msra.gmra.mxu1 %vm694_vm2, %v954_v22 }
 0x3e4   : > { %v1967_v25 = vpop.eup %1966  ;;  %1840 = vmatpush3.msra.mxu1 %v1122_v23  ;;  %1841 = vmatprep.mubr.msk.f32.mxu1 %vm2196_vm0, %v2195_v0 }
 0x3e5   : > { %v1120_v26 = vmul.f32 %v1967_v25, %v1957_v3  ;;  %1849 = vmatprep.subr.mxu1 %v2195_v0 }
 0x3e7   : > { %1842 = vmatmul.mubr.msk.f32.vlgmr.msra.gmra.mxu1 %vm694_vm2, %v1120_v26 }
 0x3e8   : > { %1851 = vmatprep.mubr.msk.f32.mxu1 %vm2196_vm0, %v2195_v0 }
 0x407   : > { %v1283_v24 = vpop.xlane.xlu1 %1282 }
 0x408   : > { %1968 = vrcp.f32 %v1283_v24 }
 0x40b   : > { %v1287_v27 = vpop.permute.xlu1 %1286  ;;  %v703_v28 = vpop.xlane.xlu0 %702 }
 0x40c   : > { %1970 = vrcp.f32 %v703_v28  ;;  %1850 = vmatpush3.msra.mxu1 %v1287_v27 }
 0x40d   : > { %1859 = vmatprep.subr.mxu1 %v2195_v0 }
 0x415   : > { %v1969_v29 = vpop.eup %1968 }
 0x416   : > { %v1285_v30 = vmul.f32 %v1969_v29, %v1961_v14 }
 0x418   : > { %1852 = vmatmul.mubr.msk.f32.vlgmr.msra.gmra.mxu1 %vm694_vm2, %v1285_v30 }
 0x419   : > { %v1971_v31 = vpop.eup %1970  ;;  %1867 = vmatprep.mubr.msk.f32.mxu1 %vm2196_vm0, %v2195_v0  ;;  %1860 = vmatpush3.msra.mxu1 %v454_v35 }
 0x41a   : > { %v705_v32 = vmul.f32 %v1971_v31, %v1963_v15  ;;  %1861 = vmatprep.subr.mxu1 %v2195_v0 }
 0x41b   : > { %1862 = vmatpush3.msra.mxu1 %v453_v36 }
 0x41c   : > { %1857 = vmatmul.mubr.msk.f32.vlgmr.msra.gmra.mxu0 %vm694_vm2, %v705_v32  ;;  %1863 = vmatprep.subr.mxu1 %v2195_v0 }
 0x41d   : > { %1864 = vmatpush3.msra.mxu1 %v452_v41 }
 0x41e   : > { %1865 = vmatprep.subr.mxu1 %v2195_v0 }
 0x41f   : > { %1866 = vmatpush3.msra.mxu1 %v451_v42 }
 0x42f   : > { %v862_v33 = vpop.f32.mrf.mxu1 }
 0x431   : > { %v1823_v34 = vpop.f32.mrf.mxu1 }
 0x4a3   : > { %v1028_v37 = vpop.f32.mrf.mxu1 }
 0x4a4   : > { %1363 = vrot.lane.b32.xlu1 %v1028_v37, %s2200_s15 }
 0x4a5   : > { %v1833_v38 = vpop.f32.mrf.mxu1 }
 0x4a7   : > { %v1193_v39 = vpop.f32.mrf.mxu1 }
 0x4a8   : > { %1367 = vrot.lane.b32.xlu1 %v1193_v39, %s2201_s5 }
 0x4a9   : > { %v1843_v40 = vpop.f32.mrf.mxu1 }
 0x4d8   : > { %v1358_v43 = vpop.f32.mrf.mxu1 }
 0x4d9   : > { %1371 = vrot.lane.b32.xlu1 %v1358_v43, %s2202_s9 }
 0x4da   : > { %v1853_v44 = vpop.f32.mrf.mxu1 }
 0x4dc   : > { %v1448_v45 = vpop.f32.mrf.mxu0 }
 0x4de   : > { %v1858_v46 = vpop.f32.mrf.mxu0 }
 0x516   : > { %v1364_v47 = vpop.permute.xlu1 %1363 }
 0x517   : > { %v1374_v49 = vsel %vm694_vm2, %v862_v33, %v1364_v47 }
 0x51a   : > { %v1368_v48 = vpop.permute.xlu1 %1367 }
 0x51b   : > { %v1376_v50 = vsel %vm1375_vm4, %v1374_v49, %v1368_v48 }
 0x54b   : > { %v1372_v51 = vpop.permute.xlu1 %1371 }
 0x54c   : > { %v1378_v52 = vsel %vm1377_vm5, %v1376_v50, %v1372_v51 }
 0x54d   : > { %v1452_v0 = vadd.f32 %v1448_v45, %v1378_v52 }
 0x54f   : > { %1868 = vmatmul.mubr.msk.f32.vlgmr.msra.gmra.mxu1 %vm462_vm1, %v1452_v0 }
 0x60f   : > { %v1526_v54 = vpop.f32.mrf.mxu1 }
 0x610   : > { %v1527_v55 = vadd.f32 %v1737_v53, %v1526_v54 }
 0x611   : > { %v1869_v56 = vpop.f32.mrf.mxu1 }
 0x612   : > { %1530 = vst.msk [vmem:[%s426_s21] sm:$0xff] %vm462_vm1, %v1527_v55 }
 0x613   : > { %2123 = shalt.err (!%p2120_p3)
}
 0x614   : > { %s2124_s29 = scalar_lea.hbm %s2591_s13, 128  ;;  %s2128_s8 = scalar_lea.hbm %s2636_s7, 256 }
 0x615   : > { %p2125_p2 = scmp.ne.s32.totalorder %s2591_s13, %s2124_s29  ;;  %p2129_p11 = scmp.lt.s32.totalorder %s2591_s13, %s2636_s7 }
 0x616   : > { %p2130_p12 = scmp.lt.s32.totalorder %s2128_s8, %s2124_s29 }
 0x617   : > { %p2126_p10 = pnand %p2125_p2, %p2671_p5 }
 0x618   : > { %p2131_p13 = por %p2130_p12, %p2129_p11 }
 0x619   : > { %p2127_p7 = pneg %p2126_p10 }
 0x61b   : > { %p2132_p0 = pnand %p2131_p13, %p2127_p7 }
 0x61d   : > { %2135 = shalt.err (!%p2132_p0)
}
 0x61e   : > { %1882 = dma.vmem_to_hbm [thread:$0]  (%p2671_p5), %s1546_s24, 128, %s2591_s13, %s1532_s19  }
 0x61f PF: > { %s2672_s15 = sld [smem:[#allocation17_spill]]  ;;  %p2675_p1 = scmp.ge.s32.totalorder %s2186_s27, 2 }
 0x620   : > { %s2673_s5 = sld [smem:[#allocation18_spill]] }
 0x625   : > { %s1557_s9 = sand.u32 1, %s2672_s15  }
 0x626   : > { %p2674_p9 = scmp.ne.s32.totalorder %s2673_s5, 0  ;;  %s1558_s11 = scalar_lea.sflag [#allocation4], %s1557_s9 }
 0x628   : > { %p1902_p4 = pnand %p2675_p1, %p2674_p9 }
 0x62a   : > { %p1903_p6 = pneg %p1902_p4 }
 0x62c   : > { %2169 = dma.done.wait (%p1903_p6), %s1558_s11, 128  }
 0x62d   : > { %2171 = vsyncadd (%p1903_p6), %s1558_s11, 4294967168  ;;  %s2676_s27 = sld [smem:[#allocation19_spill]]  ;;  %s2678_s24 = smov %s2178_s25 }
 0x62e   : > { %s2677_s18 = sld [smem:[#allocation20_spill]]  ;;  %s2679_s25 = smov %s2182_s26 }
 0x633   : > { %p26_p8 = scmp.ge.s32.totalorder %s2676_s27, 4  }
 0x634   : > { %s2680_s26 = smov %s2677_s18 }
 0x635   :  { %28 = sbr.rel (!%p26_p8) target bundleno = 13 (0xd), region = 140 }
 0x63a   :  { %1563 = vsyncpa [#allocation3], 1 }
 0x63b   :  { %1565 = vsyncpa [#allocation3 + $0x1], 1 }
 0x63c   :  { %1566 = vsyncpa [#allocation6], 1 }
 0x63d   :  { %1568 = vsyncpa [#allocation6 + $0x1], 1 }
 0x63e   :  { %1569 = vsyncpa [#allocation9], 1 }
 0x63f   :  { %1571 = vsyncpa [#allocation9 + $0x1], 1 }
 0x640   :  { %1572 = vsyncpa [#allocation4], 1 }
 0x641   :  { %1574 = vsyncpa [#allocation4 + $0x1], 1 }

</bundles_post_ra>
